<compile_context>
chip_gen: v5e
topology: v5e:2x2
jax: 0.10.0
libtpu: 0.0.40
codegen_flags: <defaults>
</compile_context>

<pallas_src>
import functools
import math

import jax
import jax.numpy as jnp
from jax.experimental import pallas as pl
from jax.experimental.pallas import tpu as pltpu


def _dice_bce_kernel(preds_ref, targets_ref,
                     inter_ref, union_ref, bce_ref,
                     acc_pt, acc_u, acc_b,
                     *, tiles_per_split, num_tiles, tile, rows,
                     valid_last, ragged, has_phantom):
    s = pl.program_id(0)                     # split (parallel on v7x megacore)
    j = pl.program_id(1)                     # column tile within split (reduction)
    g = s * tiles_per_split + j              # global column-tile index

    @pl.when(j == 0)
    def _init():
        acc_pt[...] = jnp.zeros_like(acc_pt)
        acc_u[...] = jnp.zeros_like(acc_u)
        acc_b[...] = jnp.zeros_like(acc_b)

    # Stream in native dtype, compute in f32 (v5e has no bf16 VPU/EUP).
    x = preds_ref[...].astype(jnp.float32)   # raw logits
    t = targets_ref[...].astype(jnp.float32)

    # p = sigmoid(x) via tanh: one EUP push instead of exp + full-precision divide.
    p = 0.5 * jnp.tanh(0.5 * x) + 0.5
    # BCEWithLogitsLoss element applied to the sigmoided preds, exactly as the module
    # does (double sigmoid on purpose). Since p in (0,1): max(p,0)==p and |p|==p, and
    # exp(-p) in (0.36, 1) so plain log(1+.) is exact enough.
    bce = p * (1.0 - t) + jnp.log(1.0 + jnp.exp(-p))
    pt = p * t
    u = p + t

    def _acc(v_pt, v_u, v_b):
        acc_pt[...] += v_pt
        acc_u[...] += v_u
        acc_b[...] += v_b

    if ragged:
        # Only the globally-last tile contains out-of-bounds lanes -> mask only there.
        @pl.when(g < num_tiles - 1)
        def _full():
            _acc(pt, u, bce)

        @pl.when(g == num_tiles - 1)
        def _masked():
            col = jax.lax.broadcasted_iota(jnp.int32, (rows, tile), 1)
            m = col < valid_last
            _acc(jnp.where(m, pt, 0.0),
                 jnp.where(m, u, 0.0),
                 jnp.where(m, bce, 0.0))
    elif has_phantom:
        @pl.when(g < num_tiles)
        def _real():
            _acc(pt, u, bce)
    else:
        _acc(pt, u, bce)

    @pl.when(j == tiles_per_split - 1)
    def _finalize():
        # Single cross-lane reduction per split; per-row partials go to tiny outputs,
        # the dice ratio / means are computed in the JAX wrapper.
        inter_ref[...] = jnp.sum(acc_pt[...], axis=1, keepdims=True)[None]
        union_ref[...] = jnp.sum(acc_u[...], axis=1, keepdims=True)[None]
        bce_ref[...] = jnp.sum(acc_b[...], axis=1, keepdims=True)[None]


def _round_down_multiple(x, m):
    return (x // m) * m


def dice_bce_loss(preds, targets, *, max_tile=65536, num_splits=2,
                  vmem_budget_bytes=20 * 1024 * 1024):
    """preds, targets: (B, C, H, W) float arrays. Returns scalar float32 loss."""
    assert preds.shape == targets.shape
    B = preds.shape[0]
    N = int(math.prod(preds.shape[1:]))

    # --- row packing: (B, N) -> (rows, L), rows a multiple of 8 when possible ---------
    R = None
    for r in (1, 2, 4, 8):
        if N % r == 0 and (B * r) % 8 == 0:
            R = r
            break
    if R is None:                      # best effort: largest r (<=8) dividing N
        for r in (8, 4, 2, 1):
            if N % r == 0:
                R = r
                break
    rows = B * R
    L = N // R

    p2 = preds.reshape(rows, L)        # single reshape; no padding pass over HBM
    t2 = targets.reshape(rows, L)

    # --- tile width from VMEM budget: 2 inputs x 2 pipeline buffers + 3 f32 acc -------
    per_col = rows * (2 * p2.dtype.itemsize + 2 * t2.dtype.itemsize + 3 * 4)
    cap = max(128, _round_down_multiple(min(max_tile, vmem_budget_bytes // per_col), 128))
    if L <= cap:
        tile, ragged = L, False        # single full-width tile (block == full dim)
    else:
        tile, ragged = cap, (L % cap != 0)

    num_tiles = pl.cdiv(L, tile)
    ns = max(1, min(num_splits, num_tiles))
    tiles_per_split = pl.cdiv(num_tiles, ns)
    has_phantom = ns * tiles_per_split > num_tiles
    valid_last = L - (num_tiles - 1) * tile

    if has_phantom:
        col_map = lambda s, j: (0, jnp.minimum(s * tiles_per_split + j, num_tiles - 1))
    else:
        col_map = lambda s, j: (0, s * tiles_per_split + j)
    out_map = lambda s, j: (s, 0, 0)

    kernel = functools.partial(
        _dice_bce_kernel,
        tiles_per_split=tiles_per_split, num_tiles=num_tiles, tile=tile, rows=rows,
        valid_last=valid_last, ragged=ragged, has_phantom=has_phantom)

    part_shape = jax.ShapeDtypeStruct((ns, rows, 1), jnp.float32)
    part_spec = pl.BlockSpec((1, rows, 1), out_map)

    inter_s, union_s, bce_s = pl.pallas_call(
        kernel,
        out_shape=(part_shape, part_shape, part_shape),
        grid_spec=pltpu.PrefetchScalarGridSpec(
            num_scalar_prefetch=0,
            grid=(ns, tiles_per_split),
            in_specs=[
                pl.BlockSpec((rows, tile), col_map),
                pl.BlockSpec((rows, tile), col_map),
            ],
            out_specs=(part_spec, part_spec, part_spec),
            scratch_shapes=[
                pltpu.VMEM((rows, tile), jnp.float32),   # sum(p*t) partials
                pltpu.VMEM((rows, tile), jnp.float32),   # sum(p+t) partials
                pltpu.VMEM((rows, tile), jnp.float32),   # sum(bce elem) partials
            ],
        ),
        compiler_params=pltpu.CompilerParams(
            dimension_semantics=("parallel", "arbitrary"),
            vmem_limit_bytes=32 * 1024 * 1024,
        ),
    )(p2, t2)

    # Tiny final combine on (ns, rows, 1) partials (negligible work).
    inter_b = jnp.sum(inter_s, axis=(0, 2)).reshape(B, R).sum(axis=1)   # (B,)
    union_b = jnp.sum(union_s, axis=(0, 2)).reshape(B, R).sum(axis=1)   # (B,)
    bce_loss = jnp.sum(bce_s) / float(B * N)
    smooth = 1e-6
    dice = 1.0 - (2.0 * inter_b + smooth) / (union_b + smooth)
    return bce_loss + jnp.mean(dice)


def _reference(preds, targets):
    # Pure-JAX mirror of the PyTorch module.
    p = jax.nn.sigmoid(preds.astype(jnp.float32))
    t = targets.astype(jnp.float32)
    bce = jnp.mean(jnp.maximum(p, 0.0) - p * t + jnp.log1p(jnp.exp(-jnp.abs(p))))
    smooth = 1e-6
    inter = jnp.sum(p * t, axis=(1, 2, 3))
    union = jnp.sum(p, axis=(1, 2, 3)) + jnp.sum(t, axis=(1, 2, 3))
    dice = 1.0 - (2.0 * inter + smooth) / (union + smooth)
    return bce + jnp.mean(dice)


if __name__ == "__main__":
    key = jax.random.PRNGKey(0)
    ks = jax.random.split(key, 6)

    def make(shape, kp, kt):
        logits = jax.random.normal(kp, shape, dtype=jnp.float32)
        tgts = (jax.random.uniform(kt, shape) > 0.5).astype(jnp.float32)
        return logits, tgts

    # A) default path: B=2, C=4, H=W=16 -> rows=8, L=256, single full-width tile.
    preds, tgts = make((2, 4, 16, 16), ks[0], ks[1])
    out = jax.block_until_ready(dice_bce_loss(preds, tgts))
    ref = jax.block_until_ready(_reference(preds, tgts))
    assert jnp.allclose(out, ref, atol=1e-4, rtol=1e-4), (out, ref)

    # B) multi-tile, both splits active (tile=128 -> 2 tiles, one per split).
    out_b = jax.block_until_ready(dice_bce_loss(preds, tgts, max_tile=128))
    assert jnp.allclose(out_b, ref, atol=1e-4, rtol=1e-4), (out_b, ref)

    # C) ragged last tile (L=243, not a multiple of 128) -- no padding pass, where-mask.
    preds_c, tgts_c = make((2, 3, 18, 18), ks[2], ks[3])
    out_c = jax.block_until_ready(dice_bce_loss(preds_c, tgts_c, max_tile=128))
    ref_c = jax.block_until_ready(_reference(preds_c, tgts_c))
    assert jnp.allclose(out_c, ref_c, atol=1e-4, rtol=1e-4), (out_c, ref_c)

    # D) phantom grid step + multi-tile accumulation per split (3 tiles over 2 splits).
    preds_d, tgts_d = make((2, 6, 16, 16), ks[4], ks[5])
    out_d = jax.block_until_ready(dice_bce_loss(preds_d, tgts_d, max_tile=128))
    ref_d = jax.block_until_ready(_reference(preds_d, tgts_d))
    assert jnp.allclose(out_d, ref_d, atol=1e-4, rtol=1e-4), (out_d, ref_d)

    print("KERNEL_OK")
</pallas_src>

<mosaic_0001>
module attributes {stable_mosaic.version = 11 : i64} {
  func.func @_dice_bce_kernel(%arg0: i32, %arg1: i32, %arg2: memref<8x256xf32, #tpu.memory_space<vmem>>, %arg3: memref<8x256xf32, #tpu.memory_space<vmem>>, %arg4: memref<1x8x1xf32, #tpu.memory_space<vmem>>, %arg5: memref<1x8x1xf32, #tpu.memory_space<vmem>>, %arg6: memref<1x8x1xf32, #tpu.memory_space<vmem>>, %arg7: memref<8x256xf32, #tpu.memory_space<vmem>>, %arg8: memref<8x256xf32, #tpu.memory_space<vmem>>, %arg9: memref<8x256xf32, #tpu.memory_space<vmem>>) attributes {dimension_semantics = [#tpu.dimension_semantics<parallel>, #tpu.dimension_semantics<arbitrary>], iteration_bounds = array<i64: 1, 1>, scalar_prefetch = 0 : i64, scratch_operands = 3 : i64, tpu.core_type = #tpu.core_type<tc>, window_params = [{transform_indices = @transform_0, window_bounds = array<i64: 8, 256>}, {transform_indices = @transform_1, window_bounds = array<i64: 8, 256>}, {transform_indices = @transform_2, window_bounds = array<i64: 1, 8, 1>}, {transform_indices = @transform_3, window_bounds = array<i64: 1, 8, 1>}, {transform_indices = @transform_4, window_bounds = array<i64: 1, 8, 1>}]} {
    %c0_i32 = arith.constant 0 : i32
    %0 = arith.cmpi eq, %arg1, %c0_i32 : i32
    %1 = arith.extui %0 : i1 to i32
    %c0_i32_0 = arith.constant 0 : i32
    %2 = arith.cmpi ne, %1, %c0_i32_0 : i32
    scf.if %2 {
      %cst_23 = arith.constant 0.000000e+00 : f32
      %36 = vector.broadcast %cst_23 : f32 to vector<8x256xf32>
      %c0_24 = arith.constant 0 : index
      %c0_25 = arith.constant 0 : index
      %37 = vector.load %arg7[%c0_24, %c0_25] : memref<8x256xf32, #tpu.memory_space<vmem>>, vector<8x256xf32>
      tpu.vector_store %arg7[%c0_24, %c0_25], %36 {strides = array<i32>} : memref<8x256xf32, #tpu.memory_space<vmem>>, vector<8x256xf32>,
      %cst_26 = arith.constant 0.000000e+00 : f32
      %38 = vector.broadcast %cst_26 : f32 to vector<8x256xf32>
      %c0_27 = arith.constant 0 : index
      %c0_28 = arith.constant 0 : index
      %39 = vector.load %arg8[%c0_27, %c0_28] : memref<8x256xf32, #tpu.memory_space<vmem>>, vector<8x256xf32>
      tpu.vector_store %arg8[%c0_27, %c0_28], %38 {strides = array<i32>} : memref<8x256xf32, #tpu.memory_space<vmem>>, vector<8x256xf32>,
      %cst_29 = arith.constant 0.000000e+00 : f32
      %40 = vector.broadcast %cst_29 : f32 to vector<8x256xf32>
      %c0_30 = arith.constant 0 : index
      %c0_31 = arith.constant 0 : index
      %41 = vector.load %arg9[%c0_30, %c0_31] : memref<8x256xf32, #tpu.memory_space<vmem>>, vector<8x256xf32>
      tpu.vector_store %arg9[%c0_30, %c0_31], %40 {strides = array<i32>} : memref<8x256xf32, #tpu.memory_space<vmem>>, vector<8x256xf32>,
    } else {
    }
    %c0 = arith.constant 0 : index
    %c0_1 = arith.constant 0 : index
    %3 = vector.load %arg2[%c0, %c0_1] : memref<8x256xf32, #tpu.memory_space<vmem>>, vector<8x256xf32>
    %c0_2 = arith.constant 0 : index
    %c0_3 = arith.constant 0 : index
    %4 = vector.load %arg3[%c0_2, %c0_3] : memref<8x256xf32, #tpu.memory_space<vmem>>, vector<8x256xf32>
    %cst = arith.constant 5.000000e-01 : f32
    %5 = vector.broadcast %cst : f32 to vector<8x256xf32>
    %6 = arith.mulf %5, %3 : vector<8x256xf32>
    %7 = math.tanh %6 : vector<8x256xf32>
    %cst_4 = arith.constant 5.000000e-01 : f32
    %8 = vector.broadcast %cst_4 : f32 to vector<8x256xf32>
    %9 = arith.mulf %8, %7 : vector<8x256xf32>
    %cst_5 = arith.constant 5.000000e-01 : f32
    %10 = vector.broadcast %cst_5 : f32 to vector<8x256xf32>
    %11 = arith.addf %9, %10 : vector<8x256xf32>
    %cst_6 = arith.constant 1.000000e+00 : f32
    %12 = vector.broadcast %cst_6 : f32 to vector<8x256xf32>
    %13 = arith.subf %12, %4 : vector<8x256xf32>
    %14 = arith.mulf %11, %13 : vector<8x256xf32>
    %cst_7 = arith.constant 0.000000e+00 : f32
    %15 = vector.broadcast %cst_7 : f32 to vector<8x256xf32>
    %16 = arith.subf %15, %11 : vector<8x256xf32>
    %17 = math.exp %16 : vector<8x256xf32>
    %cst_8 = arith.constant 1.000000e+00 : f32
    %18 = vector.broadcast %cst_8 : f32 to vector<8x256xf32>
    %19 = arith.addf %18, %17 : vector<8x256xf32>
    %20 = math.log %19 : vector<8x256xf32>
    %21 = arith.addf %14, %20 : vector<8x256xf32>
    %22 = arith.mulf %11, %4 : vector<8x256xf32>
    %23 = arith.addf %11, %4 : vector<8x256xf32>
    %c0_9 = arith.constant 0 : index
    %c0_10 = arith.constant 0 : index
    %24 = vector.load %arg7[%c0_9, %c0_10] : memref<8x256xf32, #tpu.memory_space<vmem>>, vector<8x256xf32>
    %25 = arith.addf %24, %22 : vector<8x256xf32>
    %c0_11 = arith.constant 0 : index
    %c0_12 = arith.constant 0 : index
    %26 = vector.load %arg7[%c0_11, %c0_12] : memref<8x256xf32, #tpu.memory_space<vmem>>, vector<8x256xf32>
    tpu.vector_store %arg7[%c0_11, %c0_12], %25 {strides = array<i32>} : memref<8x256xf32, #tpu.memory_space<vmem>>, vector<8x256xf32>,
    %c0_13 = arith.constant 0 : index
    %c0_14 = arith.constant 0 : index
    %27 = vector.load %arg8[%c0_13, %c0_14] : memref<8x256xf32, #tpu.memory_space<vmem>>, vector<8x256xf32>
    %28 = arith.addf %27, %23 : vector<8x256xf32>
    %c0_15 = arith.constant 0 : index
    %c0_16 = arith.constant 0 : index
    %29 = vector.load %arg8[%c0_15, %c0_16] : memref<8x256xf32, #tpu.memory_space<vmem>>, vector<8x256xf32>
    tpu.vector_store %arg8[%c0_15, %c0_16], %28 {strides = array<i32>} : memref<8x256xf32, #tpu.memory_space<vmem>>, vector<8x256xf32>,
    %c0_17 = arith.constant 0 : index
    %c0_18 = arith.constant 0 : index
    %30 = vector.load %arg9[%c0_17, %c0_18] : memref<8x256xf32, #tpu.memory_space<vmem>>, vector<8x256xf32>
    %31 = arith.addf %30, %21 : vector<8x256xf32>
    %c0_19 = arith.constant 0 : index
    %c0_20 = arith.constant 0 : index
    %32 = vector.load %arg9[%c0_19, %c0_20] : memref<8x256xf32, #tpu.memory_space<vmem>>, vector<8x256xf32>
    tpu.vector_store %arg9[%c0_19, %c0_20], %31 {strides = array<i32>} : memref<8x256xf32, #tpu.memory_space<vmem>>, vector<8x256xf32>,
    %c0_i32_21 = arith.constant 0 : i32
    %33 = arith.cmpi eq, %arg1, %c0_i32_21 : i32
    %34 = arith.extui %33 : i1 to i32
    %c0_i32_22 = arith.constant 0 : i32
    %35 = arith.cmpi ne, %34, %c0_i32_22 : i32
    scf.if %35 {
      %c0_23 = arith.constant 0 : index
      %c0_24 = arith.constant 0 : index
      %36 = vector.load %arg7[%c0_23, %c0_24] : memref<8x256xf32, #tpu.memory_space<vmem>>, vector<8x256xf32>
      %cst_25 = arith.constant dense<0.000000e+00> : vector<8xf32>
      %37 = vector.multi_reduction <add>, %36, %cst_25 [1] : vector<8x256xf32> to vector<8xf32>
      %38 = vector.shape_cast %37 : vector<8xf32> to vector<8x1xf32>
      %39 = vector.shape_cast %38 : vector<8x1xf32> to vector<1x8x1xf32>
      %c0_26 = arith.constant 0 : index
      %c0_27 = arith.constant 0 : index
      %c0_28 = arith.constant 0 : index
      %40 = vector.load %arg4[%c0_26, %c0_27, %c0_28] : memref<1x8x1xf32, #tpu.memory_space<vmem>>, vector<1x8x1xf32>
      tpu.vector_store %arg4[%c0_26, %c0_27, %c0_28], %39 {strides = array<i32>} : memref<1x8x1xf32, #tpu.memory_space<vmem>>, vector<1x8x1xf32>,
      %c0_29 = arith.constant 0 : index
      %c0_30 = arith.constant 0 : index
      %41 = vector.load %arg8[%c0_29, %c0_30] : memref<8x256xf32, #tpu.memory_space<vmem>>, vector<8x256xf32>
      %cst_31 = arith.constant dense<0.000000e+00> : vector<8xf32>
      %42 = vector.multi_reduction <add>, %41, %cst_31 [1] : vector<8x256xf32> to vector<8xf32>
      %43 = vector.shape_cast %42 : vector<8xf32> to vector<8x1xf32>
      %44 = vector.shape_cast %43 : vector<8x1xf32> to vector<1x8x1xf32>
      %c0_32 = arith.constant 0 : index
      %c0_33 = arith.constant 0 : index
      %c0_34 = arith.constant 0 : index
      %45 = vector.load %arg5[%c0_32, %c0_33, %c0_34] : memref<1x8x1xf32, #tpu.memory_space<vmem>>, vector<1x8x1xf32>
      tpu.vector_store %arg5[%c0_32, %c0_33, %c0_34], %44 {strides = array<i32>} : memref<1x8x1xf32, #tpu.memory_space<vmem>>, vector<1x8x1xf32>,
      %c0_35 = arith.constant 0 : index
      %c0_36 = arith.constant 0 : index
      %46 = vector.load %arg9[%c0_35, %c0_36] : memref<8x256xf32, #tpu.memory_space<vmem>>, vector<8x256xf32>
      %cst_37 = arith.constant dense<0.000000e+00> : vector<8xf32>
      %47 = vector.multi_reduction <add>, %46, %cst_37 [1] : vector<8x256xf32> to vector<8xf32>
      %48 = vector.shape_cast %47 : vector<8xf32> to vector<8x1xf32>
      %49 = vector.shape_cast %48 : vector<8x1xf32> to vector<1x8x1xf32>
      %c0_38 = arith.constant 0 : index
      %c0_39 = arith.constant 0 : index
      %c0_40 = arith.constant 0 : index
      %50 = vector.load %arg6[%c0_38, %c0_39, %c0_40] : memref<1x8x1xf32, #tpu.memory_space<vmem>>, vector<1x8x1xf32>
      tpu.vector_store %arg6[%c0_38, %c0_39, %c0_40], %49 {strides = array<i32>} : memref<1x8x1xf32, #tpu.memory_space<vmem>>, vector<1x8x1xf32>,
    } else {
    }
    return
  }
  func.func @transform_0(%arg0: i32, %arg1: i32) -> (i32, i32) {
    %c1_i32 = arith.constant 1 : i32
    %0 = arith.muli %arg0, %c1_i32 : i32
    %1 = arith.addi %0, %arg1 : i32
    %c0_i32 = arith.constant 0 : i32
    %c0_i32_0 = arith.constant 0 : i32
    return %c0_i32, %1 : i32, i32
  }
  func.func @transform_1(%arg0: i32, %arg1: i32) -> (i32, i32) {
    %c1_i32 = arith.constant 1 : i32
    %0 = arith.muli %arg0, %c1_i32 : i32
    %1 = arith.addi %0, %arg1 : i32
    %c0_i32 = arith.constant 0 : i32
    %c0_i32_0 = arith.constant 0 : i32
    return %c0_i32, %1 : i32, i32
  }
  func.func @transform_2(%arg0: i32, %arg1: i32) -> (i32, i32, i32) {
    %c0_i32 = arith.constant 0 : i32
    %c0_i32_0 = arith.constant 0 : i32
    %c0_i32_1 = arith.constant 0 : i32
    return %arg0, %c0_i32, %c0_i32_0 : i32, i32, i32
  }
  func.func @transform_3(%arg0: i32, %arg1: i32) -> (i32, i32, i32) {
    %c0_i32 = arith.constant 0 : i32
    %c0_i32_0 = arith.constant 0 : i32
    %c0_i32_1 = arith.constant 0 : i32
    return %arg0, %c0_i32, %c0_i32_0 : i32, i32, i32
  }
  func.func @transform_4(%arg0: i32, %arg1: i32) -> (i32, i32, i32) {
    %c0_i32 = arith.constant 0 : i32
    %c0_i32_0 = arith.constant 0 : i32
    %c0_i32_1 = arith.constant 0 : i32
    return %arg0, %c0_i32, %c0_i32_0 : i32, i32, i32
  }
}

</mosaic_0001>

<bundles_post_ra>
// kernel: tpu_custom_call.1
= control target key start
LH: loop header
LB: loop body
LE: loop exit
PB: predicated region body
PF: predicated region fallthrough
CT: control target
= control target key end

     0   :  { %10 = vsyncpa [#allocation6], 0  ;;  %s260_s0 = inlined_call_operand.hbm [shape: f32[8,256], index: 0, kind: input, shape index: {}]   ;;  %s261_s1 = inlined_call_operand.hbm [shape: f32[8,256], index: 1, kind: input, shape index: {}]   ;;  %s262_s2 = inlined_call_operand.vmem [shape: f32[1,8,1], index: 2, kind: output, shape index: {0}]   ;;  %s263_s3 = inlined_call_operand.vmem [shape: f32[1,8,1], index: 3, kind: output, shape index: {1}]   ;;  %s264_s4 = inlined_call_operand.vmem [shape: f32[1,8,1], index: 4, kind: output, shape index: {2}]  }
   0x1   :  { %s21_s17 = sshll.u32 %s260_s0, 4  ;;  %s22_s17 = int_to_ptr.hbm [resolvable:$true] %s21_s17 }
   0x2   :  { %11 = vsyncpa [#allocation8], 0  ;;  %s218_s18 = smov [#allocation5]   ;;  %s36_s22 = sshll.u32 %s261_s1, 4  ;;  %s37_s22 = int_to_ptr.hbm [resolvable:$true] %s36_s22 }
   0x3   :  { %s23_s19 = sshll.u32 %s218_s18, 4  ;;  %s219_s23 = smov [#allocation7]   ;;  %s24_s19 = int_to_ptr.vmem [resolvable:$true] %s23_s19 }
   0x4   :  { %26 = dma.hbm_to_vmem [thread:$0]  %s22_s17, 256, %s24_s19, [#allocation6]  }
   0x5   :  { %s38_s24 = sshll.u32 %s219_s23, 4  ;;  %s39_s24 = int_to_ptr.vmem [resolvable:$true] %s38_s24 }
   0x6   :  { %41 = dma.hbm_to_vmem [thread:$0]  %s37_s22, 256, %s39_s24, [#allocation8]  }
   0x7   :  { %214 = dma.done.wait [#allocation6], 256  }
   0x8   :  { %215 = vsyncadd [#allocation6], 4294967040 }
   0x9   :  { %216 = dma.done.wait [#allocation8], 256  }
   0xa   :  { %217 = vsyncadd [#allocation8], 4294967040  ;;  %v64_v0 = vld [vmem:[#allocation5] sm:$0xff]  ;;  %v65_v1 = vld [vmem:[#allocation5 + $0x8] sm:$0xff]  ;;  %vm124_vm0 = vcmask 7168  }
   0xb   :  { %v68_v2 = vmul.f32 0.5, %v64_v0  ;;  %v69_v3 = vmul.f32 0.5, %v65_v1  ;;  %v66_v7 = vld [vmem:[#allocation7] sm:$0xff]  ;;  %v67_v9 = vld [vmem:[#allocation7 + $0x8] sm:$0xff] }
   0xc   :  { %v76_v26 = vsub.f32 1.0, %v66_v7  ;;  %v77_v27 = vsub.f32 1.0, %v67_v9 }
   0xd   :  { %154 = vtanh.f32 %v68_v2 }
   0xe   :  { %156 = vtanh.f32 %v69_v3 }
  0x13   :  { %v155_v4 = vpop.eup %154 }
  0x14   :  { %v157_v5 = vpop.eup %156  ;;  %v72_v6 = vmul.f32 0.5, %v155_v4 }
  0x15   :  { %v73_v8 = vmul.f32 0.5, %v157_v5 }
  0x16   :  { %v74_v10 = vadd.f32 0.5, %v72_v6 }
  0x17   :  { %v75_v11 = vadd.f32 0.5, %v73_v8 }
  0x18   :  { %v94_v12 = vmul.f32 %v74_v10, %v66_v7  ;;  %v80_v13 = vsub.f32 0.0, %v74_v10  ;;  %v96_v19 = vadd.f32 %v74_v10, %v66_v7  ;;  %v78_v28 = vmul.f32 %v76_v26, %v74_v10 }
  0x19   :  { %v95_v14 = vmul.f32 %v75_v11, %v67_v9  ;;  %v81_v15 = vsub.f32 0.0, %v75_v11  ;;  %v97_v20 = vadd.f32 %v75_v11, %v67_v9  ;;  %v79_v30 = vmul.f32 %v77_v27, %v75_v11 }
  0x1a   :  { %v82_v16 = vmul.f32 1.442695, %v80_v13 }
  0x1b   :  { %v121_v17 = vadd.f32 %v95_v14, %v94_v12  ;;  %v84_v18 = vmul.f32 1.442695, %v81_v15  ;;  %v128_v21 = vadd.f32 %v97_v20, %v96_v19 }
  0x1c   :  { %158 = vpow2.f32 %v82_v16 }
  0x1d   :  { %122 = vadd.xlane.f32.xlu0 %v121_v17  ;;  %160 = vpow2.f32 %v84_v18 }
  0x22   :  { %v159_v22 = vpop.eup %158 }
  0x23   :  { %v161_v23 = vpop.eup %160  ;;  %v86_v24 = vadd.f32 1.0, %v159_v22 }
  0x24   :  { %v87_v25 = vadd.f32 1.0, %v161_v23 }
  0x25   :  { %129 = vadd.xlane.f32.xlu0 %v128_v21  ;;  %162 = vlog2.f32 %v86_v24 }
  0x26   :  { %164 = vlog2.f32 %v87_v25 }
  0x2b   :  { %v163_v29 = vpop.eup %162 }
  0x2c   :  { %v165_v31 = vpop.eup %164  ;;  %v89_v32 = vmul.f32 0.6931472, %v163_v29 }
  0x2d   :  { %v91_v33 = vmul.f32 0.6931472, %v165_v31 }
  0x2e   :  { %v92_v34 = vadd.f32 %v89_v32, %v78_v28 }
  0x2f   :  { %v93_v35 = vadd.f32 %v91_v33, %v79_v30 }
  0x31   :  { %v134_v36 = vadd.f32 %v93_v35, %v92_v34 }
  0x33   :  { %135 = vadd.xlane.f32.xlu1 %v134_v36 }
  0x90   :  { %v123_v37 = vpop.xlane.xlu0 %122 }
  0x91   :  { %125 = vst.msk [vmem:[%s262_s2] sm:$0xff] %vm124_vm0, %v123_v37 }
  0x98   :  { %v130_v38 = vpop.xlane.xlu0 %129 }
  0x99   :  { %131 = vst.msk [vmem:[%s263_s3] sm:$0xff] %vm124_vm0, %v130_v38 }
  0xa6   :  { %v136_v39 = vpop.xlane.xlu1 %135 }
  0xa7   :  { %137 = vst.msk [vmem:[%s264_s4] sm:$0xff] %vm124_vm0, %v136_v39 }
  0xa8   :  { %150 = vsyncpa [#allocation6], 1 }
  0xa9   :  { %151 = vsyncpa [#allocation8], 1 }

</bundles_post_ra>
